<compile_context>
chip_gen: v7x
topology: tpu7x:2x2x1
jax: 0.10.0
libtpu: 0.0.40
codegen_flags: <defaults>
</compile_context>

<pallas_src>
import functools

import jax
import jax.numpy as jnp
from jax import lax
from jax.experimental import pallas as pl
from jax.experimental.pallas import tpu as pltpu


def _round_up(x, m):
    return (x + m - 1) // m * m


def _softmax_rows(x):
    # numerically-stable softmax over the class (lane) axis, f32 in / f32 out.
    m = jnp.max(x, axis=-1, keepdims=True)
    e = jnp.exp(x - m)
    denom = jnp.sum(e, axis=-1, keepdims=True)
    return e * pl.reciprocal(denom, approx=True)


def late_fusion_kernel(img_ref, w_img_ref, b_img_ref,
                       tok0_ref, w_dense_ref, b_dense_ref,
                       w_out_ref, b_out_ref,
                       w_fuse_ref, b_fuse_ref,
                       score_ref, acc_ref, *, num_classes):
    k = pl.program_id(1)

    @pl.when(k == 0)
    def _():
        acc_ref[...] = jnp.zeros_like(acc_ref)

    # --- image branch matmul: accumulate partial products over K = C*H*W ---
    acc_ref[...] += jnp.dot(img_ref[...], w_img_ref[...],
                            preferred_element_type=jnp.float32)

    # --- epilogue: runs once per batch tile, on the last K step ---
    @pl.when(k == pl.num_programs(1) - 1)
    def _():
        neg = jnp.float32(-1e30)
        col = lax.broadcasted_iota(jnp.int32, acc_ref.shape, 1)
        valid = col < num_classes          # mask padded class lanes before softmax

        # image branch: logits -> softmax(dim=1)
        img_logits = acc_ref[...] + b_img_ref[...]
        img_soft = _softmax_rows(jnp.where(valid, img_logits, neg))

        # text branch (RobertaClassificationHead stand-in): tok0 -> dense ->
        # tanh -> out_proj -> softmax(dim=1).  bf16 matmuls, f32 accumulation.
        h = jnp.tanh(jnp.dot(tok0_ref[...], w_dense_ref[...],
                             preferred_element_type=jnp.float32) + b_dense_ref[...])
        text_logits = jnp.dot(h.astype(w_out_ref.dtype), w_out_ref[...],
                              preferred_element_type=jnp.float32) + b_out_ref[...]
        text_soft = _softmax_rows(jnp.where(valid, text_logits, neg))

        # late fusion: Linear(2, 1) over (img, text) pairs per class.
        w0 = w_fuse_ref[0]
        w1 = w_fuse_ref[1]
        b = b_fuse_ref[0]
        score_ref[...] = w0 * img_soft + w1 * text_soft + b


def init_params(key, img_feat_dim, text_dim, num_classes):
    ks = jax.random.split(key, 4)
    s = 0.02
    return dict(
        w_img=s * jax.random.normal(ks[0], (img_feat_dim, num_classes), jnp.float32),
        b_img=jnp.zeros((1, num_classes), jnp.float32),
        w_dense=s * jax.random.normal(ks[1], (text_dim, text_dim), jnp.float32),
        b_dense=jnp.zeros((1, text_dim), jnp.float32),
        w_out=s * jax.random.normal(ks[2], (text_dim, num_classes), jnp.float32),
        b_out=jnp.zeros((1, num_classes), jnp.float32),
        w_fuse=jax.random.normal(ks[3], (1, 2), jnp.float32),   # Linear(2, 1).weight
        b_fuse=jnp.zeros((1, 1), jnp.float32),                  # Linear(2, 1).bias
    )


def late_fusion_forward(img_input, text_emb, params, *, max_tk=2048):
    B = img_input.shape[0]
    num_classes = params["w_img"].shape[1]
    D = params["w_dense"].shape[0]
    K = 1
    for d in img_input.shape[1:]:
        K *= d

    # ---- padded / tiled sizes ----
    tb = min(128, _round_up(B, 8))             # batch (sublane/MXU M) tile
    Bp = _round_up(B, tb)
    tk = min(max(128, _round_up(max_tk, 128)), _round_up(K, 128))   # contraction tile
    Kp = _round_up(K, tk)
    Dp = _round_up(D, 128)                     # text hidden, lane aligned
    Np = _round_up(num_classes, 128)           # classes padded to lane-dense 128

    f32, bf16 = jnp.float32, jnp.bfloat16

    # activations: NCHW flatten + <s>-token pool, padded & streamed as bf16.
    img_feat = jnp.pad(img_input.reshape(B, -1).astype(bf16),
                       ((0, Bp - B), (0, Kp - K)))
    tok0 = jnp.pad(text_emb[:, 0, :].astype(bf16),
                   ((0, Bp - B), (0, Dp - D)))

    # weights streamed in bf16 (halves HBM traffic); biases stay f32.
    w_img = jnp.pad(params["w_img"].astype(bf16), ((0, Kp - K), (0, Np - num_classes)))
    b_img = jnp.pad(params["b_img"].astype(f32), ((0, 0), (0, Np - num_classes)))
    w_dense = jnp.pad(params["w_dense"].astype(bf16), ((0, Dp - D), (0, Dp - D)))
    b_dense = jnp.pad(params["b_dense"].astype(f32), ((0, 0), (0, Dp - D)))
    w_out = jnp.pad(params["w_out"].astype(bf16), ((0, Dp - D), (0, Np - num_classes)))
    b_out = jnp.pad(params["b_out"].astype(f32), ((0, 0), (0, Np - num_classes)))
    w_fuse = params["w_fuse"].astype(f32).reshape(-1)   # (2,) scalars -> SMEM
    b_fuse = params["b_fuse"].astype(f32).reshape(-1)   # (1,) scalar  -> SMEM

    grid = (Bp // tb, Kp // tk)
    smem = pltpu.MemorySpace.SMEM

    in_specs = [
        pl.BlockSpec((tb, tk), lambda i, k: (i, k)),    # img_feat tile (pipelined)
        pl.BlockSpec((tk, Np), lambda i, k: (k, 0)),    # w_img tile (pipelined over K)
        pl.BlockSpec((1, Np), lambda i, k: (0, 0)),     # b_img  (resident)
        pl.BlockSpec((tb, Dp), lambda i, k: (i, 0)),    # tok0   (resident over K)
        pl.BlockSpec((Dp, Dp), lambda i, k: (0, 0)),    # w_dense (resident)
        pl.BlockSpec((1, Dp), lambda i, k: (0, 0)),     # b_dense (resident)
        pl.BlockSpec((Dp, Np), lambda i, k: (0, 0)),    # w_out  (resident)
        pl.BlockSpec((1, Np), lambda i, k: (0, 0)),     # b_out  (resident)
        pl.BlockSpec(memory_space=smem),                # w_fuse scalars
        pl.BlockSpec(memory_space=smem),                # b_fuse scalar
    ]
    out_spec = pl.BlockSpec((tb, Np), lambda i, k: (i, 0))

    cost = pl.CostEstimate(
        flops=2 * Bp * Kp * Np + 2 * Bp * Dp * Dp + 2 * Bp * Dp * Np,
        transcendentals=Bp * (2 * Np + Dp),
        bytes_accessed=(img_feat.nbytes + w_img.nbytes + tok0.nbytes
                        + w_dense.nbytes + w_out.nbytes
                        + b_img.nbytes + b_dense.nbytes + b_out.nbytes
                        + Bp * Np * 4),
    )

    kernel = functools.partial(late_fusion_kernel, num_classes=num_classes)

    score = pl.pallas_call(
        kernel,
        out_shape=jax.ShapeDtypeStruct((Bp, Np), f32),
        grid_spec=pltpu.PrefetchScalarGridSpec(
            num_scalar_prefetch=0,
            grid=grid,
            in_specs=in_specs,
            out_specs=out_spec,
            scratch_shapes=[pltpu.VMEM((tb, Np), jnp.float32)],   # f32 accumulator
        ),
        compiler_params=pltpu.CompilerParams(
            dimension_semantics=("parallel", "arbitrary"),
            vmem_limit_bytes=32 * 1024 * 1024,
        ),
        cost_estimate=cost,
    )(img_feat, w_img, b_img, tok0, w_dense, b_dense, w_out, b_out, w_fuse, b_fuse)

    # Linear(2, 1) keeps a trailing singleton dim; drop batch/class padding.
    return score[:B, :num_classes, None]


def _reference_forward(img_input, text_emb, params):
    # Pure-JAX reference mirroring the kernel's bf16 streaming / f32 accumulate.
    B = img_input.shape[0]
    bf16 = jnp.bfloat16
    img_feat = img_input.reshape(B, -1).astype(bf16)
    tok0 = text_emb[:, 0, :].astype(bf16)
    img_logits = jnp.dot(img_feat, params["w_img"].astype(bf16),
                         preferred_element_type=jnp.float32) + params["b_img"]
    img_soft = jax.nn.softmax(img_logits, axis=1)
    h = jnp.tanh(jnp.dot(tok0, params["w_dense"].astype(bf16),
                         preferred_element_type=jnp.float32) + params["b_dense"])
    text_logits = jnp.dot(h.astype(bf16), params["w_out"].astype(bf16),
                          preferred_element_type=jnp.float32) + params["b_out"]
    text_soft = jax.nn.softmax(text_logits, axis=1)
    w0 = params["w_fuse"][0, 0]
    w1 = params["w_fuse"][0, 1]
    b = params["b_fuse"][0, 0]
    return (w0 * img_soft + w1 * text_soft + b)[:, :, None]


if __name__ == "__main__":
    key = jax.random.PRNGKey(0)
    k_img, k_txt, k_par = jax.random.split(key, 3)

    B, C_img, H, W = 2, 3, 16, 16        # small stand-in for 3x384x384 images
    S, D = 8, 128                        # short sequence, small hidden dim
    num_classes = 16

    img_input = jax.random.normal(k_img, (B, C_img, H, W), jnp.float32)   # NCHW
    text_emb = jax.random.normal(k_txt, (B, S, D), jnp.float32)           # stand-in XLM-R states

    params = init_params(k_par, C_img * H * W, D, num_classes)

    # max_tk=256 -> K=768 is split into 3 contraction tiles to exercise the
    # accumulate / epilogue path even at toy sizes.
    score = late_fusion_forward(img_input, text_emb, params, max_tk=256)
    jax.block_until_ready(score)
    assert score.shape == (B, num_classes, 1)

    ref = _reference_forward(img_input, text_emb, params)
    max_err = float(jnp.max(jnp.abs(score - ref)))
    assert max_err < 5e-2, f"max abs err vs reference: {max_err}"

    print("KERNEL_OK")
</pallas_src>

<mosaic_0001>
module attributes {stable_mosaic.version = 11 : i64} {
  func.func @late_fusion_kernel(%arg0: i32, %arg1: i32, %arg2: memref<8x256xbf16, #tpu.memory_space<vmem>>, %arg3: memref<256x128xbf16, #tpu.memory_space<vmem>>, %arg4: memref<1x128xf32, #tpu.memory_space<vmem>>, %arg5: memref<8x128xbf16, #tpu.memory_space<vmem>>, %arg6: memref<128x128xbf16, #tpu.memory_space<vmem>>, %arg7: memref<1x128xf32, #tpu.memory_space<vmem>>, %arg8: memref<128x128xbf16, #tpu.memory_space<vmem>>, %arg9: memref<1x128xf32, #tpu.memory_space<vmem>>, %arg10: memref<2xf32, #tpu.memory_space<smem>>, %arg11: memref<1xf32, #tpu.memory_space<smem>>, %arg12: memref<8x128xf32, #tpu.memory_space<vmem>>, %arg13: memref<8x128xf32, #tpu.memory_space<vmem>>) attributes {dimension_semantics = [#tpu.dimension_semantics<parallel>, #tpu.dimension_semantics<arbitrary>], iteration_bounds = array<i64: 1, 3>, scalar_prefetch = 0 : i64, scratch_operands = 1 : i64, tpu.core_type = #tpu.core_type<tc>, window_params = [{transform_indices = @transform_0, window_bounds = array<i64: 8, 256>}, {transform_indices = @transform_1, window_bounds = array<i64: 256, 128>}, {pipeline_mode = #tpu.pipeline_mode<synchronous>, transform_indices = @transform_2, window_bounds = array<i64: 1, 128>}, {transform_indices = @transform_3, window_bounds = array<i64: 8, 128>}, {pipeline_mode = #tpu.pipeline_mode<synchronous>, transform_indices = @transform_4, window_bounds = array<i64: 128, 128>}, {pipeline_mode = #tpu.pipeline_mode<synchronous>, transform_indices = @transform_5, window_bounds = array<i64: 1, 128>}, {pipeline_mode = #tpu.pipeline_mode<synchronous>, transform_indices = @transform_6, window_bounds = array<i64: 128, 128>}, {pipeline_mode = #tpu.pipeline_mode<synchronous>, transform_indices = @transform_7, window_bounds = array<i64: 1, 128>}, {transform_indices = @transform_8, window_bounds = array<i64: 2>}, {transform_indices = @transform_9, window_bounds = array<i64: 1>}, {transform_indices = @transform_10, window_bounds = array<i64: 8, 128>}]} {
    %c0_i32 = arith.constant 0 : i32
    %0 = arith.cmpi eq, %arg1, %c0_i32 : i32
    %1 = arith.extui %0 : i1 to i32
    %c0_i32_0 = arith.constant 0 : i32
    %2 = arith.cmpi ne, %1, %c0_i32_0 : i32
    scf.if %2 {
      %cst_9 = arith.constant 0.000000e+00 : f32
      %12 = vector.broadcast %cst_9 : f32 to vector<8x128xf32>
      %c0_10 = arith.constant 0 : index
      %c0_11 = arith.constant 0 : index
      %13 = vector.load %arg13[%c0_10, %c0_11] : memref<8x128xf32, #tpu.memory_space<vmem>>, vector<8x128xf32>
      tpu.vector_store %arg13[%c0_10, %c0_11], %12 {strides = array<i32>} : memref<8x128xf32, #tpu.memory_space<vmem>>, vector<8x128xf32>,
    } else {
    }
    %c0 = arith.constant 0 : index
    %c0_1 = arith.constant 0 : index
    %3 = vector.load %arg13[%c0, %c0_1] : memref<8x128xf32, #tpu.memory_space<vmem>>, vector<8x128xf32>
    %c0_2 = arith.constant 0 : index
    %c0_3 = arith.constant 0 : index
    %4 = vector.load %arg2[%c0_2, %c0_3] : memref<8x256xbf16, #tpu.memory_space<vmem>>, vector<8x256xbf16>
    %c0_4 = arith.constant 0 : index
    %c0_5 = arith.constant 0 : index
    %5 = vector.load %arg3[%c0_4, %c0_5] : memref<256x128xbf16, #tpu.memory_space<vmem>>, vector<256x128xbf16>
    %cst = arith.constant dense<0.000000e+00> : vector<8x128xf32>
    %6 = tpu.matmul %4, %5, %cst {dimension_numbers = #tpu.dot_dimension_numbers<[1], [0], [0], [1], [0, 0, 1, 1], [], []>} : vector<8x256xbf16>, vector<256x128xbf16>, vector<8x128xf32> -> vector<8x128xf32>
    %7 = arith.addf %3, %6 : vector<8x128xf32>
    %c0_6 = arith.constant 0 : index
    %c0_7 = arith.constant 0 : index
    %8 = vector.load %arg13[%c0_6, %c0_7] : memref<8x128xf32, #tpu.memory_space<vmem>>, vector<8x128xf32>
    tpu.vector_store %arg13[%c0_6, %c0_7], %7 {strides = array<i32>} : memref<8x128xf32, #tpu.memory_space<vmem>>, vector<8x128xf32>,
    %c2_i32 = arith.constant 2 : i32
    %9 = arith.cmpi eq, %arg1, %c2_i32 : i32
    %10 = arith.extui %9 : i1 to i32
    %c0_i32_8 = arith.constant 0 : i32
    %11 = arith.cmpi ne, %10, %c0_i32_8 : i32
    scf.if %11 {
      %12 = tpu.iota {dimensions = array<i32: 1>} : vector<8x128xi32>
      %c16_i32 = arith.constant 16 : i32
      %13 = vector.broadcast %c16_i32 : i32 to vector<8x128xi32>
      %14 = arith.cmpi slt, %12, %13 : vector<8x128xi32>
      %c0_9 = arith.constant 0 : index
      %c0_10 = arith.constant 0 : index
      %15 = vector.load %arg13[%c0_9, %c0_10] : memref<8x128xf32, #tpu.memory_space<vmem>>, vector<8x128xf32>
      %c0_11 = arith.constant 0 : index
      %c0_12 = arith.constant 0 : index
      %16 = vector.load %arg4[%c0_11, %c0_12] : memref<1x128xf32, #tpu.memory_space<vmem>>, vector<1x128xf32>
      %17 = vector.broadcast %16 : vector<1x128xf32> to vector<8x128xf32>
      %18 = arith.addf %15, %17 : vector<8x128xf32>
      %cst_13 = arith.constant -1.000000e+30 : f32
      %19 = vector.broadcast %cst_13 : f32 to vector<8x128xf32>
      %20 = arith.select %14, %18, %19 : vector<8x128xi1>, vector<8x128xf32>
      %cst_14 = arith.constant dense<0xFF800000> : vector<8xf32>
      %21 = vector.multi_reduction <maximumf>, %20, %cst_14 [1] : vector<8x128xf32> to vector<8xf32>
      %22 = vector.shape_cast %21 : vector<8xf32> to vector<8x1xf32>
      %23 = vector.broadcast %22 : vector<8x1xf32> to vector<8x128xf32>
      %24 = arith.subf %20, %23 : vector<8x128xf32>
      %25 = math.exp %24 : vector<8x128xf32>
      %cst_15 = arith.constant dense<0.000000e+00> : vector<8xf32>
      %26 = vector.multi_reduction <add>, %25, %cst_15 [1] : vector<8x128xf32> to vector<8xf32>
      %27 = vector.shape_cast %26 : vector<8xf32> to vector<8x1xf32>
      %28 = tpu.reciprocal %27 {approx = true} : vector<8x1xf32> -> vector<8x1xf32>
      %29 = vector.broadcast %28 : vector<8x1xf32> to vector<8x128xf32>
      %30 = arith.mulf %25, %29 : vector<8x128xf32>
      %c0_16 = arith.constant 0 : index
      %c0_17 = arith.constant 0 : index
      %31 = vector.load %arg5[%c0_16, %c0_17] : memref<8x128xbf16, #tpu.memory_space<vmem>>, vector<8x128xbf16>
      %c0_18 = arith.constant 0 : index
      %c0_19 = arith.constant 0 : index
      %32 = vector.load %arg6[%c0_18, %c0_19] : memref<128x128xbf16, #tpu.memory_space<vmem>>, vector<128x128xbf16>
      %cst_20 = arith.constant dense<0.000000e+00> : vector<8x128xf32>
      %33 = tpu.matmul %31, %32, %cst_20 {dimension_numbers = #tpu.dot_dimension_numbers<[1], [0], [0], [1], [0, 0, 1, 1], [], []>} : vector<8x128xbf16>, vector<128x128xbf16>, vector<8x128xf32> -> vector<8x128xf32>
      %c0_21 = arith.constant 0 : index
      %c0_22 = arith.constant 0 : index
      %34 = vector.load %arg7[%c0_21, %c0_22] : memref<1x128xf32, #tpu.memory_space<vmem>>, vector<1x128xf32>
      %35 = vector.broadcast %34 : vector<1x128xf32> to vector<8x128xf32>
      %36 = arith.addf %33, %35 : vector<8x128xf32>
      %37 = math.tanh %36 : vector<8x128xf32>
      %38 = arith.truncf %37 : vector<8x128xf32> to vector<8x128xbf16>
      %c0_23 = arith.constant 0 : index
      %c0_24 = arith.constant 0 : index
      %39 = vector.load %arg8[%c0_23, %c0_24] : memref<128x128xbf16, #tpu.memory_space<vmem>>, vector<128x128xbf16>
      %cst_25 = arith.constant dense<0.000000e+00> : vector<8x128xf32>
      %40 = tpu.matmul %38, %39, %cst_25 {dimension_numbers = #tpu.dot_dimension_numbers<[1], [0], [0], [1], [0, 0, 1, 1], [], []>} : vector<8x128xbf16>, vector<128x128xbf16>, vector<8x128xf32> -> vector<8x128xf32>
      %c0_26 = arith.constant 0 : index
      %c0_27 = arith.constant 0 : index
      %41 = vector.load %arg9[%c0_26, %c0_27] : memref<1x128xf32, #tpu.memory_space<vmem>>, vector<1x128xf32>
      %42 = vector.broadcast %41 : vector<1x128xf32> to vector<8x128xf32>
      %43 = arith.addf %40, %42 : vector<8x128xf32>
      %cst_28 = arith.constant -1.000000e+30 : f32
      %44 = vector.broadcast %cst_28 : f32 to vector<8x128xf32>
      %45 = arith.select %14, %43, %44 : vector<8x128xi1>, vector<8x128xf32>
      %cst_29 = arith.constant dense<0xFF800000> : vector<8xf32>
      %46 = vector.multi_reduction <maximumf>, %45, %cst_29 [1] : vector<8x128xf32> to vector<8xf32>
      %47 = vector.shape_cast %46 : vector<8xf32> to vector<8x1xf32>
      %48 = vector.broadcast %47 : vector<8x1xf32> to vector<8x128xf32>
      %49 = arith.subf %45, %48 : vector<8x128xf32>
      %50 = math.exp %49 : vector<8x128xf32>
      %cst_30 = arith.constant dense<0.000000e+00> : vector<8xf32>
      %51 = vector.multi_reduction <add>, %50, %cst_30 [1] : vector<8x128xf32> to vector<8xf32>
      %52 = vector.shape_cast %51 : vector<8xf32> to vector<8x1xf32>
      %53 = tpu.reciprocal %52 {approx = true} : vector<8x1xf32> -> vector<8x1xf32>
      %54 = vector.broadcast %53 : vector<8x1xf32> to vector<8x128xf32>
      %55 = arith.mulf %50, %54 : vector<8x128xf32>
      %c0_31 = arith.constant 0 : index
      %56 = memref.load %arg10[%c0_31] : memref<2xf32, #tpu.memory_space<smem>>
      %c1 = arith.constant 1 : index
      %57 = memref.load %arg10[%c1] : memref<2xf32, #tpu.memory_space<smem>>
      %c0_32 = arith.constant 0 : index
      %58 = memref.load %arg11[%c0_32] : memref<1xf32, #tpu.memory_space<smem>>
      %59 = vector.broadcast %56 : f32 to vector<8x128xf32>
      %60 = arith.mulf %59, %30 : vector<8x128xf32>
      %61 = vector.broadcast %57 : f32 to vector<8x128xf32>
      %62 = arith.mulf %61, %55 : vector<8x128xf32>
      %63 = arith.addf %60, %62 : vector<8x128xf32>
      %64 = vector.broadcast %58 : f32 to vector<8x128xf32>
      %65 = arith.addf %63, %64 : vector<8x128xf32>
      %c0_33 = arith.constant 0 : index
      %c0_34 = arith.constant 0 : index
      %66 = vector.load %arg12[%c0_33, %c0_34] : memref<8x128xf32, #tpu.memory_space<vmem>>, vector<8x128xf32>
      tpu.vector_store %arg12[%c0_33, %c0_34], %65 {strides = array<i32>} : memref<8x128xf32, #tpu.memory_space<vmem>>, vector<8x128xf32>,
    } else {
    }
    return
  }
  func.func @transform_0(%arg0: i32, %arg1: i32) -> (i32, i32) {
    %c0_i32 = arith.constant 0 : i32
    return %arg0, %arg1 : i32, i32
  }
  func.func @transform_1(%arg0: i32, %arg1: i32) -> (i32, i32) {
    %c0_i32 = arith.constant 0 : i32
    %c0_i32_0 = arith.constant 0 : i32
    return %arg1, %c0_i32 : i32, i32
  }
  func.func @transform_2(%arg0: i32, %arg1: i32) -> (i32, i32) {
    %c0_i32 = arith.constant 0 : i32
    %c0_i32_0 = arith.constant 0 : i32
    %c0_i32_1 = arith.constant 0 : i32
    return %c0_i32, %c0_i32_0 : i32, i32
  }
  func.func @transform_3(%arg0: i32, %arg1: i32) -> (i32, i32) {
    %c0_i32 = arith.constant 0 : i32
    %c0_i32_0 = arith.constant 0 : i32
    return %arg0, %c0_i32 : i32, i32
  }
  func.func @transform_4(%arg0: i32, %arg1: i32) -> (i32, i32) {
    %c0_i32 = arith.constant 0 : i32
    %c0_i32_0 = arith.constant 0 : i32
    %c0_i32_1 = arith.constant 0 : i32
    return %c0_i32, %c0_i32_0 : i32, i32
  }
  func.func @transform_5(%arg0: i32, %arg1: i32) -> (i32, i32) {
    %c0_i32 = arith.constant 0 : i32
    %c0_i32_0 = arith.constant 0 : i32
    %c0_i32_1 = arith.constant 0 : i32
    return %c0_i32, %c0_i32_0 : i32, i32
  }
  func.func @transform_6(%arg0: i32, %arg1: i32) -> (i32, i32) {
    %c0_i32 = arith.constant 0 : i32
    %c0_i32_0 = arith.constant 0 : i32
    %c0_i32_1 = arith.constant 0 : i32
    return %c0_i32, %c0_i32_0 : i32, i32
  }
  func.func @transform_7(%arg0: i32, %arg1: i32) -> (i32, i32) {
    %c0_i32 = arith.constant 0 : i32
    %c0_i32_0 = arith.constant 0 : i32
    %c0_i32_1 = arith.constant 0 : i32
    return %c0_i32, %c0_i32_0 : i32, i32
  }
  func.func @transform_8(%arg0: i32, %arg1: i32) -> i32 {
    %c0_i32 = arith.constant 0 : i32
    %c0_i32_0 = arith.constant 0 : i32
    return %c0_i32 : i32
  }
  func.func @transform_9(%arg0: i32, %arg1: i32) -> i32 {
    %c0_i32 = arith.constant 0 : i32
    %c0_i32_0 = arith.constant 0 : i32
    return %c0_i32 : i32
  }
  func.func @transform_10(%arg0: i32, %arg1: i32) -> (i32, i32) {
    %c0_i32 = arith.constant 0 : i32
    %c0_i32_0 = arith.constant 0 : i32
    return %arg0, %c0_i32 : i32, i32
  }
}

</mosaic_0001>

<bundles_post_ra>
// kernel: tpu_custom_call.1
= control target key start
LH: loop header
LB: loop body
LE: loop exit
PB: predicated region body
PF: predicated region fallthrough
CT: control target
= control target key end

     0   :  { %s2011_s0 = inlined_call_operand.hbm [shape: bf16[8,768], index: 0, kind: input, shape index: {}]   ;;  %s2012_s1 = inlined_call_operand.hbm [shape: bf16[768,128], index: 1, kind: input, shape index: {}]   ;;  %s2013_s2 = inlined_call_operand.vmem [shape: f32[1,128], index: 2, kind: input, shape index: {}]   ;;  %s2014_s3 = inlined_call_operand.vmem [shape: bf16[8,128], index: 3, kind: input, shape index: {}]   ;;  %s2015_s4 = inlined_call_operand.hbm [shape: bf16[128,128], index: 4, kind: input, shape index: {}]   ;;  %s2016_s5 = inlined_call_operand.vmem [shape: f32[1,128], index: 5, kind: input, shape index: {}]   ;;  %s2017_s6 = inlined_call_operand.hbm [shape: bf16[128,128], index: 6, kind: input, shape index: {}]   ;;  %s2018_s7 = inlined_call_operand.vmem [shape: f32[1,128], index: 7, kind: input, shape index: {}]   ;;  %s2019_s8 = inlined_call_operand.vmem [shape: f32[2], index: 8, kind: input, shape index: {}]   ;;  %s2020_s9 = inlined_call_operand.<no memory space> [shape: f32[1], index: 9, kind: input, shape index: {}]   ;;  %s2021_s10 = inlined_call_operand.hbm [shape: f32[8,128], index: 10, kind: output, shape index: {}]  }
   0x1   :  { %2027 = sst [smem:[#allocation21_spill]] %s2015_s4 }
   0x2   :  { %2028 = sst [smem:[#allocation22_spill]] %s2018_s7 }
   0x3   :  { %2029 = sst [smem:[#allocation23_spill]] %s2019_s8 }
   0x4   :  { %2030 = sst [smem:[#allocation24_spill]] %s2021_s10 }
   0x5   :  { %15 = sst [smem:[#allocation3]] %s2020_s9 }
   0x6   :  { %16 = vsyncpa [#allocation5], 0 }
   0x7   :  { %18 = vsyncpa [#allocation5 + $0x1], 0 }
   0x8   :  { %19 = vsyncpa [#allocation9], 0 }
   0x9   :  { %21 = vsyncpa [#allocation9 + $0x1], 0 }
   0xa   :  { %22 = vsyncpa [#allocation12], 0 }
   0xb   :  { %23 = vsyncpa [#allocation7], 0 }
   0xc   :  { %24 = vsyncpa [#allocation6], 0  ;;  %s1677_s15 = smov 0   ;;  %s1679_s16 = smov 0  }
   0xd   :  { %s1681_s17 = smov 0   ;;  %s1683_s18 = smov 0  }
   0xe   :  { %s1685_s19 = smov 0   ;;  %s1687_s20 = smov 0  }
   0xf LB: > { %s1706_s9 = sadd.s32 4294967295, %s1606_s20   ;;  %p64_p0 = scmp.ne.s32.totalorder %s1590_s16, %s1586_s15  ;;  %s1606_s20 = sphi %s1687_s20, %s30_s20   ;;  %s1602_s19 = sphi %s1685_s19, %s2053_s19   ;;  %s1598_s18 = sphi %s1683_s18, %s2052_s18   ;;  %s1594_s17 = sphi %s1681_s17, %s2051_s17   ;;  %s1590_s16 = sphi %s1679_s16, %s2050_s16   ;;  %s1586_s15 = sphi %s1677_s15, %s2049_s15  }
  0x10   : > { %p2022_p1 = scmp.eq.s32.totalorder %s1706_s9, 0  ;;  %p1088_p2 = scmp.ge.s32.totalorder %s1606_s20, 1 }
  0x11   : > { %p300_p3 = scmp.lt.s32.totalorder %s1606_s20, 4  ;;  %s1608_s23 = smov [#allocation10]  }
  0x12   : > { %p1714_p4 = por %p2022_p1, %p64_p0  ;;  %s322_s24 = sshll.u32 %s1608_s23, 4  ;;  %s1722_s24 = int_to_ptr.vmem [resolvable:$true] %s322_s24 }
  0x13   : > { %p1718_p5 = pnand %p1088_p2, %p300_p3  ;;  %s1609_s26 = smov [#allocation11]  }
  0x14   : > { %s2031_s21 = scalar_select %p1714_p4, 1, 0 }
  0x15   : > { %p1252_p6 = pneg %p1718_p5  ;;  %s338_s27 = sshll.u32 %s1609_s26, 4  ;;  %s1732_s27 = int_to_ptr.vmem [resolvable:$true] %s338_s27 }
  0x16   : > { %s2034_s8 = sld [smem:[#allocation23_spill]]  ;;  %s2035_s4 = sld [smem:[#allocation21_spill]] }
  0x17   : > { %p1728_p7 = pnand %p1252_p6, %p2022_p1 }
  0x19   : > { %p1747_p9 = pneg %p1728_p7 }
  0x1c   : > { %s355_s30 = sshll.u32 %s2034_s8, 4  ;;  %s1379_s13 = scalar_lea.hbm %s2035_s4, 1024  ;;  %s1737_s30 = int_to_ptr.vmem [resolvable:$true] %s355_s30 }
  0x1d   : > { %p1380_p8 = scmp.ne.s32.totalorder %s2035_s4, %s1379_s13  ;;  %p1386_p12 = scmp.lt.u32.totalorder %s1379_s13, %s2035_s4 }
  0x1f   : > { %p1382_p10 = pnand %p1747_p9, %p1380_p8 }
  0x21   : > { %p1383_p11 = pneg %p1382_p10 }
  0x23   : > { %p1388_p13 = pnand %p1386_p12, %p1383_p11 }
  0x25   : > { %1391 = shalt.err (!%p1388_p13)
}
  0x26   : > { %s1392_s29 = scalar_lea.vmem %s1722_s24, 1024  ;;  %p1400_p6 = scmp.lt.s32.totalorder %s1722_s24, %s1722_s24 }
  0x27   : > { %p1393_p0 = scmp.ne.s32.totalorder %s1722_s24, %s1392_s29  ;;  %p1401_p1 = scmp.lt.s32.totalorder %s1392_s29, %s1392_s29 }
  0x29   : > { %p1395_p2 = pnand %p1393_p0, %p1747_p9  ;;  %p1402_p8 = por %p1401_p1, %p1400_p6 }
  0x2b   : > { %p1396_p3 = pneg %p1395_p2 }
  0x2d   : > { %p1403_p10 = pnand %p1402_p8, %p1396_p3 }
  0x2f   : > { %1406 = shalt.err (!%p1403_p10)
}
  0x30   : > { %s2024_s11 = smov 64   ;;  %s2025_s12 = smov 4  }
  0x31   : > { %1255 = dma.hbm_to_vmem [thread:$0]  (!%p1728_p7), %s2035_s4, 1024, %s1722_s24, [#allocation9], %s2024_s11, %s2024_s11, %s2025_s12  }
  0x32   : > { %s1407_s28 = scalar_lea.hbm %s2017_s6, 1024 }
  0x33   : > { %p1408_p1 = scmp.ne.s32.totalorder %s2017_s6, %s1407_s28  ;;  %p1414_p13 = scmp.lt.u32.totalorder %s1407_s28, %s2017_s6 }
  0x35   : > { %p1410_p11 = pnand %p1408_p1, %p1747_p9 }
  0x37   : > { %p1411_p12 = pneg %p1410_p11 }
  0x39   : > { %p1416_p0 = pnand %p1414_p13, %p1411_p12 }
  0x3b   : > { %1419 = shalt.err (!%p1416_p0)
}
  0x3c   : > { %s1420_s24 = scalar_lea.vmem %s1732_s27, 1024  ;;  %p1428_p8 = scmp.lt.s32.totalorder %s1732_s27, %s1732_s27 }
  0x3d   : > { %p1421_p2 = scmp.ne.s32.totalorder %s1732_s27, %s1420_s24  ;;  %p1429_p10 = scmp.lt.s32.totalorder %s1420_s24, %s1420_s24 }
  0x3f   : > { %p1423_p3 = pnand %p1421_p2, %p1747_p9  ;;  %p1430_p1 = por %p1429_p10, %p1428_p8 }
  0x41   : > { %p1424_p6 = pneg %p1423_p3 }
  0x43   : > { %p1431_p11 = pnand %p1430_p1, %p1424_p6 }
  0x45   : > { %1434 = shalt.err (!%p1431_p11)
}
  0x46   : > { %1258 = dma.hbm_to_vmem [thread:$0]  (!%p1728_p7), %s2017_s6, 1024, %s1732_s27, [#allocation12], %s2024_s11, %s2024_s11, %s2025_s12  }
  0x47   : > { %s1435_s10 = scalar_lea.vmem %s1737_s30, 16  ;;  %p1443_p2 = scmp.lt.s32.totalorder %s1737_s30, %s1737_s30 }
  0x48   : > { %p1436_p12 = scmp.ne.s32.totalorder %s1737_s30, %s1435_s10  ;;  %p1444_p3 = scmp.lt.s32.totalorder %s1435_s10, %s1435_s10 }
  0x4a   : > { %p1438_p13 = pnand %p1436_p12, %p1747_p9  ;;  %p1445_p6 = por %p1444_p3, %p1443_p2 }
  0x4c   : > { %p1439_p0 = pneg %p1438_p13 }
  0x4e   : > { %p1446_p8 = pnand %p1445_p6, %p1439_p0 }
  0x50   : > { %1449 = shalt.err (!%p1446_p8)
}
  0x51   : > { %s1612_s13 = smov [#allocation13]   ;;  %s51_s27 = sadd.s32 1, %s1594_s17 }
  0x52   : > { %1261 = dma.vmem_to_smem (!%p1728_p7), %s1737_s30, 16, %s1612_s13, [#allocation7]  }
  0x53   : > { %s39_s23 = sadd.s32 1, %s1602_s19  ;;  %p58_p9 = scmp.ne.s32.totalorder %s1594_s17, %s1590_s16 }
  0x54   : > { %p40_p10 = scmp.ge.s32.totalorder %s39_s23, 3  ;;  %p59_p1 = scmp.eq.s32.totalorder %s1606_s20, 0 }
  0x55   : > { %p1272_p11 = scmp.lt.s32.totalorder %s1606_s20, 3  ;;  %s1813_s25 = sand.u32 1, %s1594_s17  }
  0x56   : > { %s2055_s23 = smov (%p40_p10, %s39_s23), 0  ;;  %p60_p12 = por %p59_p1, %p58_p9 }
  0x57   : > { %s47_s14 = ssub.s32 %s1602_s19, %s2055_s23  ;;  %s1094_s30 = sshll.u32 %s1813_s25, 3 }
  0x58   : > { %p49_p7 = scmp.eq.s32.totalorder %s47_s14, 0  ;;  %s1150_s15 = sshll.u32 %s1602_s19, 7 }
  0x59   : > { %s373_s26 = scalar_lea.vmem [#allocation4], %s1094_s30  ;;  %s1827_s8 = scalar_lea.hbm %s2011_s0, %s1150_s15 }
  0x5a   : > { %s383_s28 = sshll.u32 %s373_s26, 4  ;;  %p1833_p13 = pnand %p1272_p11, %p60_p12  ;;  %s1829_s28 = int_to_ptr.vmem [resolvable:$true] %s383_s28 }
  0x5b   : > { %s1822_s29 = scalar_select %p49_p7, %s1594_s17, %s51_s27  }
  0x5c   : > { %s1097_s13 = sshll.u32 %s1813_s25, 7  ;;  %s1151_s27 = sshll.u32 %s1602_s19, 11 }
  0x5d   : > { %s1839_s14 = scalar_lea.vmem [#allocation8], %s1097_s13  ;;  %s370_s15 = scalar_lea.sflag [#allocation5], %s1813_s25 }
  0x5e   : > { %s401_s30 = sshll.u32 %s1839_s14, 4  ;;  %s1450_s26 = scalar_lea.hbm %s1827_s8, 128  ;;  %s1870_s30 = int_to_ptr.vmem [resolvable:$true] %s401_s30 }
  0x5f   : > { %p1451_p0 = scmp.ne.s32.totalorder %s1827_s8, %s1450_s26  ;;  %p1452_p2 = pneg %p1833_p13 }
  0x60   : > { %s1455_s11 = scalar_lea.hbm %s2011_s0, 384  ;;  %p1456_p8 = scmp.lt.u32.totalorder %s1827_s8, %s2011_s0 }
  0x61   : > { %p1453_p3 = pnand %p1452_p2, %p1451_p0  ;;  %p1457_p9 = scmp.lt.u32.totalorder %s1455_s11, %s1450_s26 }
  0x62   : > { %p1459_p1 = scmp.lt.u32.totalorder %s1450_s26, %s1827_s8 }
  0x63   : > { %p1454_p6 = pneg %p1453_p3  ;;  %p1458_p10 = por %p1457_p9, %p1456_p8 }
  0x65   : > { %p1460_p11 = por %p1459_p1, %p1458_p10 }
  0x67   : > { %p1461_p12 = pnand %p1460_p11, %p1454_p6 }
  0x69   : > { %1464 = shalt.err (!%p1461_p12)
}
  0x6a   : > { %s1465_s25 = scalar_lea.vmem %s1829_s28, 128  ;;  %s1613_s13 = smov [#allocation4]  }
  0x6b   : > { %p1466_p7 = scmp.ne.s32.totalorder %s1829_s28, %s1465_s25  ;;  %s1470_s24 = sshll.u32 %s1613_s13, 4  ;;  %s1471_s24 = int_to_ptr.vmem [resolvable:$false] %s1470_s24 }
  0x6c   : > { %s1472_s4 = scalar_lea.vmem %s1471_s24, 256  ;;  %p1473_p4 = scmp.lt.s32.totalorder %s1829_s28, %s1471_s24 }
  0x6d   : > { %p1468_p0 = pnand %p1466_p7, %p1452_p2  ;;  %p1474_p8 = scmp.lt.s32.totalorder %s1472_s4, %s1465_s25 }
  0x6f   : > { %p1469_p3 = pneg %p1468_p0  ;;  %p1475_p9 = por %p1474_p8, %p1473_p4 }
  0x71   : > { %p1476_p10 = pnand %p1475_p9, %p1469_p3 }
  0x73   : > { %1479 = shalt.err (!%p1476_p10)
}
  0x74   : > { %1265 = dma.hbm_to_vmem [thread:$0]  (!%p1833_p13), %s1827_s8, 128, %s1829_s28, %s370_s15  }
  0x75   : > { %s390_s11 = sand.u32 1, %s1606_s20   ;;  %s1878_s7 = scalar_lea.hbm %s2012_s1, %s1151_s27 }
  0x76   : > { %s1880_s25 = scalar_lea.sflag [#allocation9], %s390_s11  ;;  %s1480_s13 = scalar_lea.hbm %s1878_s7, 2048 }
  0x77   : > { %p1481_p4 = scmp.ne.s32.totalorder %s1878_s7, %s1480_s13  ;;  %s1485_s14 = scalar_lea.hbm %s2012_s1, 6144 }
  0x78   : > { %p1486_p11 = scmp.lt.u32.totalorder %s1878_s7, %s2012_s1  ;;  %p1487_p12 = scmp.lt.u32.totalorder %s1485_s14, %s1480_s13 }
  0x79   : > { %p1483_p6 = pnand %p1481_p4, %p1452_p2  ;;  %p1489_p0 = scmp.lt.u32.totalorder %s1480_s13, %s1878_s7 }
  0x7a   : > { %p1488_p7 = por %p1487_p12, %p1486_p11 }
  0x7b   : > { %p1484_p1 = pneg %p1483_p6 }
  0x7c   : > { %p1490_p3 = por %p1489_p0, %p1488_p7 }
  0x7e   : > { %p1491_p8 = pnand %p1490_p3, %p1484_p1 }
  0x80   : > { %1494 = shalt.err (!%p1491_p8)
}
  0x81   : > { %s1495_s27 = scalar_lea.vmem %s1870_s30, 2048  ;;  %s1614_s4 = smov [#allocation8]  }
  0x82   : > { %p1496_p9 = scmp.ne.s32.totalorder %s1870_s30, %s1495_s27  ;;  %s1500_s11 = sshll.u32 %s1614_s4, 4  ;;  %s1501_s11 = int_to_ptr.vmem [resolvable:$false] %s1500_s11 }
  0x83   : > { %s1502_s12 = scalar_lea.vmem %s1501_s11, 4096  ;;  %p1503_p6 = scmp.lt.s32.totalorder %s1870_s30, %s1501_s11 }
  0x84   : > { %p1498_p10 = pnand %p1496_p9, %p1452_p2  ;;  %p1504_p11 = scmp.lt.s32.totalorder %s1502_s12, %s1495_s27 }
  0x86   : > { %p1499_p4 = pneg %p1498_p10  ;;  %p1505_p12 = por %p1504_p11, %p1503_p6 }
  0x88   : > { %p1506_p7 = pnand %p1505_p12, %p1499_p4 }
  0x8a   : > { %1509 = shalt.err (!%p1506_p7)
}
  0x8b   : > { %s2038_s26 = smov 4   ;;  %s2039_s13 = smov 64  }
  0x8c   : > { %1268 = dma.hbm_to_vmem [thread:$0]  (!%p1833_p13), %s1878_s7, 2048, %s1870_s30, %s1880_s25, %s2039_s13, %s2039_s13, %s2038_s26  }
  0x8d   : > { %413 = sbr.rel (%p1718_p5) target bundleno = 1212 (0x4bc), region = 60  ;;  %s415_s28 = sand.u32 (!%p1718_p5), 1, %s1590_s16  }
  0x8e   : > { %s1101_s8 = sshll.u32 (!%p1718_p5), %s415_s28, 3  ;;  %s416_s14 = scalar_lea.sflag (!%p1718_p5), [#allocation5], %s415_s28 }
  0x8f   : > { %s1912_s15 = scalar_lea.vmem (!%p1718_p5), [#allocation4], %s1101_s8  ;;  %p2040_p2 = scmp.ne.s32.totalorder (!%p1718_p5), %s2031_s21, 0 }
  0x94   : > { %1561 = dma.done.wait (%p2040_p2), %s416_s14, 128  }
  0x95   : > { %1563 = vsyncadd (%p2040_p2), %s416_s14, 4294967168  ;;  %s424_s10 = sand.u32 1, %s1706_s9   ;;  %s1102_s24 = sshll.u32 %s415_s28, 7 }
  0x96   : > { %s425_s30 = scalar_lea.sflag [#allocation9], %s424_s10  ;;  %s1919_s7 = scalar_lea.vmem [#allocation8], %s1102_s24 }
  0x97   : > { %1565 = dma.done.wait (%p2040_p2), %s425_s30, 2048  }
  0x98   : > { %1567 = vsyncadd (%p2040_p2), %s425_s30, 4294965248  ;;  %p2041_p5 = scmp.eq.s32.totalorder %s1706_s9, 0 }
  0x9a   : > { %1569 = dma.done.wait (%p2041_p5), [#allocation9], 1024   ;;  %p2042_p13 = pmov %p2041_p5 }
  0x9b   : > { %p2043_p1 = pmov %p2041_p5 }
  0x9c   : > { %1571 = vsyncadd (%p2042_p13), [#allocation9], 4294966272 }
  0x9d   : > { %1573 = dma.done.wait (%p2043_p1), [#allocation12], 1024   ;;  %p2044_p0 = pmov %p2043_p1 }
  0x9f   : > { %1575 = vsyncadd (%p2044_p0), [#allocation12], 4294966272  ;;  %p2045_p3 = pmov %p2044_p0 }
  0xa0   : > { %p2046_p8 = pmov %p2044_p0 }
  0xa1   : > { %1577 = dma.done.wait (%p2045_p3), [#allocation7], 16  }
  0xa2   : > { %1579 = vsyncadd (%p2046_p8), [#allocation7], 4294967280 }
  0xa3   : > { %445 = sfence }
  0xa4   : > { %p1106_p9 = scmp.ne.s32.totalorder %s1598_s18, 0 }
  0xa5   : > { %v1615_v0 = vmov (!%p1106_p9), 0.0  }
  0xa6   : > { %492 = sbr.rel (%p1106_p9) target bundleno = 173 (0xad), region = 84  ;;  %493 = vst [vmem:[#allocation2] sm:$0xff] (!%p1106_p9), %v1615_v0 }
  0xad PF: > { %v1335_v1 = vld [vmem:[%s1919_s7 + $0x40] sm:$0xff]   ;;  %v1337_v3 = vld [vmem:[%s1919_s7 + $0x48] sm:$0xff]   ;;  %v1339_v5 = vld [vmem:[%s1919_s7 + $0x50] sm:$0xff]   ;;  %p1125_p10 = scmp.ne.s32.totalorder %s1598_s18, 2 }
  0xae   : > { %v1336_v2 = vld [vmem:[%s1919_s7] sm:$0xff]   ;;  %1152 = vmatprep.subr.bf16.mxu0 %v1335_v1  ;;  %v1338_v4 = vld [vmem:[%s1919_s7 + $0x8] sm:$0xff]   ;;  %v1340_v6 = vld [vmem:[%s1919_s7 + $0x10] sm:$0xff]   ;;  %v1616_v28 = vmov (!%p1125_p10), 0.0   ;;  %vm1617_vm0 = vmmov (!%p1125_p10), 0   ;;  %v677_v45 = vlaneseq (!%p1125_p10)  ;;  %s2047_s26 = sld [smem:[#allocation22_spill]] (!%p1125_p10) }
  0xaf   : > { %1153 = vmatpush3.bf16.msra.mxu0 %v1336_v2  ;;  %v1341_v7 = vld [vmem:[%s1919_s7 + $0x58] sm:$0xff]   ;;  %v1343_v9 = vld [vmem:[%s1919_s7 + $0x60] sm:$0xff]   ;;  %v1345_v11 = vld [vmem:[%s1919_s7 + $0x68] sm:$0xff]   ;;  %1212 = vmatprep.subr.bf16.mxu1 (!%p1125_p10), %v1616_v28  ;;  %s934_s13 = sld [smem:[#allocation13]] (!%p1125_p10)  ;;  %s1145_s28 = sld [smem:[#allocation13 + $0x1]] (!%p1125_p10) }
  0xb0   : > { %1154 = vmatprep.subr.bf16.mxu0 %v1337_v3  ;;  %v1342_v8 = vld [vmem:[%s1919_s7 + $0x18] sm:$0xff]   ;;  %v1344_v10 = vld [vmem:[%s1919_s7 + $0x20] sm:$0xff]   ;;  %v1346_v14 = vld [vmem:[%s1919_s7 + $0x28] sm:$0xff]   ;;  %1228 = vmatprep.mubr.msk.bf16.mxu1 (!%p1125_p10), %vm1617_vm0, %v1616_v28  ;;  %v678_v49 = vand.u32 (!%p1125_p10), 127, %v677_v45  ;;  %s936_s8 = sld [smem:[#allocation3]] (!%p1125_p10) }
  0xb1   : > { %v495_v12 = vld [vmem:[%s1912_s15] sm:$0xff]  ;;  %v494_v21 = vld [vmem:[#allocation2] sm:$0xff]  ;;  %v1353_v27 = vld [vmem:[#allocation10] sm:$0xff] (!%p1125_p10)  }
  0xb2   : > { %v1108_v13 = vcombine.high %v495_v12, %v495_v12  ;;  %v1347_v15 = vld [vmem:[%s1919_s7 + $0x70] sm:$0xff]   ;;  %v1349_v17 = vld [vmem:[%s1919_s7 + $0x78] sm:$0xff]   ;;  %v1107_v19 = vcombine.low %v495_v12, %v495_v12  ;;  %v1354_v29 = vld [vmem:[#allocation10 + $0x8] sm:$0xff] (!%p1125_p10)   ;;  %vm679_vm1 = vcmp.lt.s32.totalorder (!%p1125_p10), %v678_v49, 16 }
  0xb3   : > { %1155 = vmatpush3.bf16.msra.mxu0 %v1338_v4  ;;  %v1348_v16 = vld [vmem:[%s1919_s7 + $0x30] sm:$0xff]   ;;  %v1350_v18 = vld [vmem:[%s1919_s7 + $0x38] sm:$0xff]   ;;  %v1361_v31 = vld [vmem:[#allocation11] sm:$0xff] (!%p1125_p10)  }
  0xb4   : > { %1156 = vmatprep.subr.bf16.mxu0 %v1339_v5  ;;  %663 = vmatprep.mubr.bf16.mxu0 %v1108_v13  ;;  %v1355_v30 = vld [vmem:[#allocation10 + $0x10] sm:$0xff] (!%p1125_p10)   ;;  %v1356_v32 = vld [vmem:[#allocation10 + $0x18] sm:$0xff] (!%p1125_p10)   ;;  %v1362_v33 = vld [vmem:[#allocation11 + $0x8] sm:$0xff] (!%p1125_p10)  }
  0xb5   : > { %1213 = vmatpush3.bf16.msra.mxu1 (!%p1125_p10), %v1361_v31  ;;  %v1357_v34 = vld [vmem:[#allocation10 + $0x20] sm:$0xff] (!%p1125_p10)   ;;  %v1363_v35 = vld [vmem:[#allocation11 + $0x10] sm:$0xff] (!%p1125_p10)   ;;  %v1358_v36 = vld [vmem:[#allocation10 + $0x28] sm:$0xff] (!%p1125_p10)  }
  0xb6   : > { %1214 = vmatprep.subr.bf16.mxu1 (!%p1125_p10), %v1616_v28  ;;  %v1364_v37 = vld [vmem:[#allocation11 + $0x18] sm:$0xff] (!%p1125_p10)   ;;  %v1359_v38 = vld [vmem:[#allocation10 + $0x30] sm:$0xff] (!%p1125_p10)   ;;  %v699_v40 = vld [vmem:[%s2014_s3] sm:$0xf] (!%p1125_p10) }
  0xb7   : > { %1157 = vmatpush3.bf16.msra.mxu0 %v1340_v6  ;;  %v1360_v39 = vld [vmem:[#allocation10 + $0x38] sm:$0xff] (!%p1125_p10)   ;;  %v1365_v41 = vld [vmem:[#allocation11 + $0x20] sm:$0xff] (!%p1125_p10)   ;;  %v1366_v42 = vld [vmem:[#allocation11 + $0x28] sm:$0xff] (!%p1125_p10)  }
  0xb8   : > { %1158 = vmatprep.subr.bf16.mxu0 %v1341_v7  ;;  %v1367_v43 = vld [vmem:[#allocation11 + $0x30] sm:$0xff] (!%p1125_p10)   ;;  %v1368_v44 = vld [vmem:[#allocation11 + $0x38] sm:$0xff] (!%p1125_p10)   ;;  %v1126_v47 = vld [vmem:[%s2013_s2] ss:$0 sm:$0xff] (!%p1125_p10) }
  0xb9   : > { %1215 = vmatpush3.bf16.msra.mxu1 (!%p1125_p10), %v1362_v33  ;;  %v1127_v51 = vld [vmem:[%s2016_s5] ss:$0 sm:$0xff] (!%p1125_p10) }
  0xba   : > { %1216 = vmatprep.subr.bf16.mxu1 (!%p1125_p10), %v1616_v28  ;;  %v1136_v63 = vld [vmem:[%s2047_s26] ss:$0 sm:$0xff] (!%p1125_p10) }
  0xbb   : > { %1159 = vmatpush3.bf16.msra.mxu0 %v1342_v8 }
  0xbc   : > { %1160 = vmatprep.subr.bf16.mxu0 %v1343_v9 }
  0xbd   : > { %1217 = vmatpush3.bf16.msra.mxu1 (!%p1125_p10), %v1363_v35 }
  0xbe   : > { %1218 = vmatprep.subr.bf16.mxu1 (!%p1125_p10), %v1616_v28 }
  0xbf   : > { %1161 = vmatpush3.bf16.msra.mxu0 %v1344_v10 }
  0xc0   : > { %1162 = vmatprep.subr.bf16.mxu0 %v1345_v11 }
  0xc1   : > { %1219 = vmatpush3.bf16.msra.mxu1 (!%p1125_p10), %v1364_v37 }
  0xc2   : > { %1220 = vmatprep.subr.bf16.mxu1 (!%p1125_p10), %v1616_v28 }
  0xc3   : > { %1163 = vmatpush3.bf16.msra.mxu0 %v1346_v14 }
  0xc4   : > { %1164 = vmatprep.subr.bf16.mxu0 %v1347_v15  ;;  %v937_v15 = vstv (!%p1125_p10), %s934_s13 }
  0xc5   : > { %1221 = vmatpush3.bf16.msra.mxu1 (!%p1125_p10), %v1365_v41 }
  0xc6   : > { %1222 = vmatprep.subr.bf16.mxu1 (!%p1125_p10), %v1616_v28 }
  0xc7   : > { %1165 = vmatpush3.bf16.msra.mxu0 %v1348_v16  ;;  %v939_v16 = vstv (!%p1125_p10), %s1145_s28 }
  0xc8   : > { %1166 = vmatprep.subr.bf16.mxu0 %v1349_v17 }
  0xc9   : > { %1223 = vmatpush3.bf16.msra.mxu1 (!%p1125_p10), %v1366_v42 }
  0xca   : > { %1224 = vmatprep.subr.bf16.mxu1 (!%p1125_p10), %v1616_v28 }
  0xcb   : > { %1167 = vmatpush3.bf16.msra.mxu0 %v1350_v18 }
  0xcc   : > { %1192 = vmatprep.subr.bf16.mxu0 (!%p1125_p10), %v1616_v28 }
  0xcd   : > { %1225 = vmatpush3.bf16.msra.mxu1 (!%p1125_p10), %v1367_v43 }
  0xce   : > { %664 = vmatmul.mubr.bf16.vlgmr.msra.gmra.mrb[0].mxu0 %v1107_v19  ;;  %1226 = vmatprep.subr.bf16.mxu1 (!%p1125_p10), %v1616_v28 }
  0xcf   : > { %1193 = vmatpush3.bf16.msra.mxu0 (!%p1125_p10), %v1353_v27  ;;  %1208 = vmatprep.mubr.msk.bf16.mxu0 (!%p1125_p10), %vm1617_vm0, %v1616_v28 }
  0xd0   : > { %1194 = vmatprep.subr.bf16.mxu0 (!%p1125_p10), %v1616_v28 }
  0xd1   : > { %1227 = vmatpush3.bf16.msra.mxu1 (!%p1125_p10), %v1368_v44 }
  0xd3   : > { %1195 = vmatpush3.bf16.msra.mxu0 (!%p1125_p10), %v1354_v29 }
  0xd4   : > { %1196 = vmatprep.subr.bf16.mxu0 (!%p1125_p10), %v1616_v28 }
  0xd7   : > { %1197 = vmatpush3.bf16.msra.mxu0 (!%p1125_p10), %v1355_v30 }
  0xd8   : > { %1198 = vmatprep.subr.bf16.mxu0 (!%p1125_p10), %v1616_v28 }
  0xdb   : > { %1199 = vmatpush3.bf16.msra.mxu0 (!%p1125_p10), %v1356_v32 }
  0xdc   : > { %1200 = vmatprep.subr.bf16.mxu0 (!%p1125_p10), %v1616_v28 }
  0xdf   : > { %1201 = vmatpush3.bf16.msra.mxu0 (!%p1125_p10), %v1357_v34 }
  0xe0   : > { %1202 = vmatprep.subr.bf16.mxu0 (!%p1125_p10), %v1616_v28 }
  0xe3   : > { %1203 = vmatpush3.bf16.msra.mxu0 (!%p1125_p10), %v1358_v36 }
  0xe4   : > { %1204 = vmatprep.subr.bf16.mxu0 (!%p1125_p10), %v1616_v28 }
  0xe7   : > { %1205 = vmatpush3.bf16.msra.mxu0 (!%p1125_p10), %v1359_v38 }
  0xe8   : > { %1206 = vmatprep.subr.bf16.mxu0 (!%p1125_p10), %v1616_v28 }
  0xeb   : > { %1207 = vmatpush3.bf16.msra.mxu0 (!%p1125_p10), %v1360_v39 }
 0x1a1   : > { %v1168_v20 = vpop.f32.mrb[0].mxu0  ;;  %676 = sbr.rel (%p1125_p10) target bundleno = 1181 (0x49d), region = 88 }
 0x1a2   : > { %v1169_v22 = vpop.f32.mrb[1].mxu0 }
 0x1a3   : > { %v1170_v23 = vadd.f32 %v1169_v22, %v1168_v20  ;;  %v1171_v24 = vpop.f32.mrb[2].mxu0  ;;  %v942_v20 = vstv (!%p1125_p10), %s936_s8 }
 0x1a4   : > { %v1172_v25 = vpop.f32.mrb[3].mxu0  ;;  %1209 = vmatmul.mubr.bf16.vlgmr.msra.gmra.mrb[0].mxu0 (!%p1125_p10), %v699_v40 }
 0x1a5   : > { %v671_v26 = vadd.f32 %v1170_v23, %v494_v21 }
 0x1a7   : > { %672 = vst [vmem:[#allocation2] sm:$0xff] %v671_v26 }
 0x1ae   : > { %v680_v46 = vld [vmem:[#allocation2] sm:$0xff] }
 0x1af   : > { %v688_v48 = vadd.f32 %v1126_v47, %v680_v46 }
 0x1b1   : > { %v689_v50 = vsel %vm679_vm1, %v688_v48, -1e+30 }
 0x1b2   : > { %690 = vmax.xlane.f32.xlu0 %v689_v50 }
 0x23f   : > { %v691_v59 = vpop.xlane.xlu0 %690 }
 0x240   : > { %v692_v60 = vsub.f32 %v689_v50, %v691_v59 }
 0x242   : > { %v693_v61 = vmul.f32 1.442695, %v692_v60 }
 0x277   : > { %v805_v52 = vpop.f32.mrb[0].mxu0 }
 0x278   : > { %v806_v53 = vadd.f32 %v1127_v51, %v805_v52  ;;  %v1210_v54 = vpop.f32.mrb[1].mxu0 }
 0x279   : > { %v808_v55 = vpop.f32.mrb[2].mxu0 }
 0x27a   : > { %1369 = vtanh.f32 %v806_v53  ;;  %v1211_v56 = vpop.f32.mrb[3].mxu0 }
 0x27b   : > { %1371 = vpow2.f32 %v693_v61 }
 0x284   : > { %v1370_v57 = vpop.eup %1369 }
 0x285   : > { %v812_v58 = vpack.c.bf16 %v1370_v57, %v1370_v57  ;;  %v1372_v62 = vpop.eup %1371 }
 0x286   : > { %695 = vadd.xlane.f32.xlu1 %v1372_v62 }
 0x287   : > { %1229 = vmatmul.mubr.bf16.vlgmr.msra.gmra.mrb[0].mxu1 %v812_v58 }
 0x313   : > { %v696_v10 = vpop.xlane.xlu1 %695 }
 0x35a   : > { %v918_v0 = vpop.f32.mrb[0].mxu1 }
 0x35b   : > { %v919_v1 = vadd.f32 %v1136_v63, %v918_v0  ;;  %v1230_v2 = vpop.f32.mrb[1].mxu1 }
 0x35c   : > { %v921_v3 = vpop.f32.mrb[2].mxu1 }
 0x35d   : > { %v1231_v4 = vpop.f32.mrb[3].mxu1  ;;  %v924_v5 = vsel %vm679_vm1, %v919_v1, -1e+30 }
 0x35e   : > { %925 = vmax.xlane.f32.xlu0 %v924_v5 }
 0x3eb   : > { %v926_v6 = vpop.xlane.xlu0 %925 }
 0x3ec   : > { %v927_v7 = vsub.f32 %v924_v5, %v926_v6 }
 0x3ee   : > { %v928_v8 = vmul.f32 1.442695, %v927_v7 }
 0x3f0   : > { %1373 = vpow2.f32 %v928_v8 }
 0x3f1   : > { %1375 = vrcp.f32 %v696_v10 }
 0x3fa   : > { %v1374_v9 = vpop.eup %1373 }
 0x3fb   : > { %930 = vadd.xlane.f32.xlu1 %v1374_v9  ;;  %v1376_v12 = vpop.eup %1375 }
 0x3fc   : > { %v698_v13 = vmul.f32 %v1376_v12, %v1372_v62 }
 0x3fe   : > { %v938_v18 = vmul.f32 %v937_v15, %v698_v13 }
 0x488   : > { %v931_v11 = vpop.xlane.xlu1 %930 }
 0x489   : > { %1377 = vrcp.f32 %v931_v11 }
 0x493   : > { %v1378_v14 = vpop.eup %1377 }
 0x494   : > { %v933_v17 = vmul.f32 %v1378_v14, %v1374_v9 }
 0x496   : > { %v940_v19 = vmul.f32 %v939_v16, %v933_v17 }
 0x498   : > { %v941_v21 = vadd.f32 %v940_v19, %v938_v18 }
 0x49a   : > { %v943_v22 = vadd.f32 %v942_v20, %v941_v21 }
 0x49c   : > { %944 = vst [vmem:[#allocation14] sm:$0xff] %v943_v22 }
 0x49d PF: > { %p1276_p4 = scmp.eq.s32.totalorder %s1706_s9, 2  ;;  %s1618_s14 = smov [#allocation14]  }
 0x49e   : > { %s954_s15 = sshll.u32 %s1618_s14, 4  ;;  %s955_s15 = int_to_ptr.vmem [resolvable:$true] %s954_s15 }
 0x49f   : > { %s1510_s10 = scalar_lea.vmem %s955_s15, 128  ;;  %p1517_p7 = scmp.lt.s32.totalorder %s955_s15, %s955_s15 }
 0x4a0   : > { %p1511_p6 = scmp.ne.s32.totalorder %s955_s15, %s1510_s10  ;;  %p1518_p2 = scmp.lt.s32.totalorder %s1510_s10, %s1510_s10 }
 0x4a2   : > { %p1512_p11 = pnand %p1511_p6, %p1276_p4  ;;  %p1519_p5 = por %p1518_p2, %p1517_p7 }
 0x4a4   : > { %p1513_p12 = pneg %p1512_p11 }
 0x4a6   : > { %p1520_p13 = pnand %p1519_p5, %p1513_p12 }
 0x4a8   : > { %1523 = shalt.err (!%p1520_p13)
}
 0x4a9   : > { %s2048_s7 = sld [smem:[#allocation24_spill]] }
 0x4af   : > { %s1524_s18 = scalar_lea.hbm %s2048_s7, 128 }
 0x4b0   : > { %p1525_p1 = scmp.ne.s32.totalorder %s2048_s7, %s1524_s18  ;;  %p1530_p8 = scmp.lt.u32.totalorder %s1524_s18, %s2048_s7 }
 0x4b2   : > { %p1526_p0 = pnand %p1525_p1, %p1276_p4 }
 0x4b4   : > { %p1527_p3 = pneg %p1526_p0 }
 0x4b6   : > { %p1532_p9 = pnand %p1530_p8, %p1527_p3 }
 0x4b8   : > { %1535 = shalt.err (!%p1532_p9)
}
 0x4b9   : > { %1249 = dma.vmem_to_hbm [thread:$0]  (%p1276_p4), %s955_s15, 128, %s2048_s7, [#allocation6]  }
 0x4ba   : > { %1581 = dma.done.wait (%p1276_p4), [#allocation6], 128  }
 0x4bb   : > { %1583 = vsyncadd (%p1276_p4), [#allocation6], 4294967168 }
 0x4bc PF: > { %s30_s20 = sadd.s32 1, %s1606_s20   ;;  %s2049_s15 = smov %s1590_s16 }
 0x4bd   : > { %p27_p10 = scmp.ge.s32.totalorder %s30_s20, 5   ;;  %s2050_s16 = smov %s1594_s17 }
 0x4be   : > { %s2051_s17 = smov %s1822_s29  ;;  %s2052_s18 = smov %s1602_s19 }
 0x4bf   : > { %s2053_s19 = smov %s2055_s23  ;;  %29 = sbr.rel (!%p27_p10) target bundleno = 15 (0xf), region = 135 }
 0x4c6   :  { %967 = vsyncpa [#allocation5], 1 }
 0x4c7   :  { %969 = vsyncpa [#allocation5 + $0x1], 1 }
 0x4c8   :  { %970 = vsyncpa [#allocation9], 1 }
 0x4c9   :  { %972 = vsyncpa [#allocation9 + $0x1], 1 }
 0x4ca   :  { %973 = vsyncpa [#allocation12], 1 }
 0x4cb   :  { %974 = vsyncpa [#allocation6], 1 }
 0x4cc   :  { %976 = vsyncpa [#allocation6 + $0x1], 1 }
 0x4cd   :  { %977 = vsyncpa [#allocation7], 1 }
 0x4ce   :  { %979 = vsyncpa [#allocation7 + $0x1], 1 }

</bundles_post_ra>
